<compile_context>
chip_gen: v7x
topology: tpu7x:2x2x1
jax: 0.10.0
libtpu: 0.0.40
codegen_flags: <defaults>
</compile_context>

<pallas_src>
import math
import functools

import jax
import jax.numpy as jnp
from jax import lax
from jax.experimental import pallas as pl
from jax.experimental.pallas import tpu as pltpu


# ---------------------------------------------------------------------------
# Parameter setup (glue): the sinusoidal positional-encoding buffer.
# ---------------------------------------------------------------------------
def make_positional_encoding(max_len: int, d_model: int) -> jnp.ndarray:
    """Returns pe of shape (max_len, 1, d_model), float32 (matches the torch buffer)."""
    position = jnp.arange(max_len, dtype=jnp.float32)[:, None]             # (L, 1)
    div_term = jnp.exp(
        jnp.arange(0, d_model, 2, dtype=jnp.float32) * (-math.log(10000.0) / d_model)
    )                                                                       # (D/2,)
    pe = jnp.zeros((max_len, d_model), dtype=jnp.float32)
    pe = pe.at[:, 0::2].set(jnp.sin(position * div_term))
    pe = pe.at[:, 1::2].set(jnp.cos(position * div_term))
    return pe[:, None, :]                                                   # (L, 1, D)


# ---------------------------------------------------------------------------
# Pallas kernels
# ---------------------------------------------------------------------------
def _pe_add_kernel(x_ref, pe_ref, o_ref):
    # x: (tS, B, D), pe: (tS, 1, D) — broadcast add over the batch axis.
    # pe cast happens in-kernel (VPU slack is free in a mem-bound kernel).
    o_ref[...] = (x_ref[...] + pe_ref[...].astype(x_ref.dtype)).astype(o_ref.dtype)


def _pe_add_dropout_kernel(seed_ref, x_ref, pe_ref, o_ref, *, p, tile_s, batch, d_model):
    # Training-mode inverted dropout on top of the PE add.
    y = x_ref[...] + pe_ref[...].astype(x_ref.dtype)          # (tS, B, D)
    shp = y.shape

    # --- Stateless counter-based RNG -------------------------------------
    # Key = hash(global element index, seed).  Global indices make the mask
    # invariant to the tiling and unique per tile; integer VPU ops only, so
    # it is filler work under the HBM roofline and lowers everywhere
    # (no pltpu.prng_* dependency).
    s_loc = lax.broadcasted_iota(jnp.int32, shp, 0).astype(jnp.uint32)
    b_idx = lax.broadcasted_iota(jnp.int32, shp, 1).astype(jnp.uint32)
    d_idx = lax.broadcasted_iota(jnp.int32, shp, 2).astype(jnp.uint32)
    s_glb = s_loc + (pl.program_id(0) * tile_s).astype(jnp.uint32)
    flat = (s_glb * jnp.uint32(batch) + b_idx) * jnp.uint32(d_model) + d_idx

    h = flat * jnp.uint32(0x9E3779B1) + seed_ref[0].astype(jnp.uint32)
    h = h ^ (h >> 16)
    h = h * jnp.uint32(0x7FEB352D)
    h = h ^ (h >> 15)
    h = h * jnp.uint32(0x846CA68B)
    h = h ^ (h >> 16)

    # Integer threshold compare on the low 24 bits (no float convert / mul).
    thresh = jnp.uint32(int(round(p * (1 << 24))))
    keep = (h & jnp.uint32(0x00FFFFFF)) >= thresh

    scale = jnp.asarray(1.0 / (1.0 - p), dtype=y.dtype)
    o_ref[...] = jnp.where(keep, y * scale, jnp.zeros_like(y)).astype(o_ref.dtype)


# ---------------------------------------------------------------------------
# Wrapper
# ---------------------------------------------------------------------------
def _choose_tile_s(S, B, D, itemsize, target_bytes=4 * 1024 * 1024):
    """Pick a sequence-tile so one (tS, B, D) block is ~target_bytes.

    With 2-deep double buffering of x + out (+ small pe tile) this keeps the
    resident VMEM footprint well under v7x's 64 MiB physical VMEM while
    staying large enough to sit near the HBM roofline on v5e/v6e/v7x.
    """
    row_bytes = max(1, B * D * itemsize)
    rows = max(1, target_bytes // row_bytes)
    if rows >= S:
        return int(S)
    if rows >= 8:
        rows = (rows // 8) * 8
    return int(rows)


def positional_encoding_forward(x, pe, *, p=0.1, training=False, seed=0):
    """x: (S, B, D); pe: (max_len, 1, D).  Returns dropout(x + pe[:S])."""
    S, B, D = x.shape
    assert pe.shape[0] >= S and pe.shape[2] == D

    itemsize = jnp.dtype(x.dtype).itemsize
    tS = _choose_tile_s(S, B, D, itemsize)
    grid = (pl.cdiv(S, tS),)

    # The [:S] slice of pe is expressed purely through the BlockSpec: only the
    # first ceil(S/tS) blocks of the full buffer are ever DMA'd.
    x_spec = pl.BlockSpec((tS, B, D), lambda i: (i, 0, 0))
    pe_spec = pl.BlockSpec((tS, 1, D), lambda i: (i, 0, 0))
    out_spec = pl.BlockSpec((tS, B, D), lambda i: (i, 0, 0))
    out_shape = jax.ShapeDtypeStruct((S, B, D), x.dtype)

    compiler_params = pltpu.CompilerParams(
        # Tiles are independent (the dropout mask is keyed on global indices),
        # so the S axis can be sharded over v7x's two TensorCores.
        dimension_semantics=("parallel",),
        vmem_limit_bytes=48 * 1024 * 1024,
    )

    if (not training) or p == 0.0:
        # nn.Dropout in eval mode is the identity -> just the broadcasted add.
        return pl.pallas_call(
            _pe_add_kernel,
            out_shape=out_shape,
            grid=grid,
            in_specs=[x_spec, pe_spec],
            out_specs=out_spec,
            compiler_params=compiler_params,
        )(x, pe)

    if p >= 1.0:
        return jnp.zeros_like(x)

    seed_arr = jnp.asarray([seed], dtype=jnp.int32)
    kernel = functools.partial(
        _pe_add_dropout_kernel, p=float(p), tile_s=tS, batch=B, d_model=D
    )
    return pl.pallas_call(
        kernel,
        out_shape=out_shape,
        grid=grid,
        in_specs=[
            pl.BlockSpec(memory_space=pltpu.SMEM),  # seed scalar (untiled, SMEM)
            x_spec,
            pe_spec,
        ],
        out_specs=out_spec,
        compiler_params=compiler_params,
    )(seed_arr, x, pe)


# ---------------------------------------------------------------------------
# Demo / self-check
# ---------------------------------------------------------------------------
if __name__ == "__main__":
    S, B, D = 8, 2, 32
    MAX_LEN = 64  # small synthetic max_len (module default is 5000)
    P = 0.1

    key = jax.random.PRNGKey(0)
    x = jax.random.normal(key, (S, B, D), dtype=jnp.float32)
    pe = make_positional_encoding(MAX_LEN, D)

    # Eval-mode forward (deterministic): dropout is the identity.
    out = jax.block_until_ready(positional_encoding_forward(x, pe, p=P, training=False))
    ref = x + pe[:S]
    assert out.shape == (S, B, D)
    assert jnp.allclose(out, ref, atol=1e-6, rtol=1e-6)

    # Training-mode forward: every output element must be either 0 (dropped)
    # or (x + pe) / (1 - p) (kept, inverted-dropout scaling).
    out_tr = jax.block_until_ready(
        positional_encoding_forward(x, pe, p=P, training=True, seed=123)
    )
    assert out_tr.shape == (S, B, D)
    scaled = ref / (1.0 - P)
    ok = jnp.isclose(out_tr, 0.0, atol=1e-6) | jnp.isclose(
        out_tr, scaled, atol=1e-5, rtol=1e-5
    )
    assert bool(jnp.all(ok))

    print("KERNEL_OK")
</pallas_src>

<mosaic_0001>
module attributes {stable_mosaic.version = 11 : i64} {
  func.func @_pe_add_kernel(%arg0: i32, %arg1: memref<8x2x32xf32, #tpu.memory_space<vmem>>, %arg2: memref<8x1x32xf32, #tpu.memory_space<vmem>>, %arg3: memref<8x2x32xf32, #tpu.memory_space<vmem>>) attributes {dimension_semantics = [#tpu.dimension_semantics<parallel>], iteration_bounds = array<i64: 1>, scalar_prefetch = 0 : i64, scratch_operands = 0 : i64, tpu.core_type = #tpu.core_type<tc>, window_params = [{transform_indices = @transform_0, window_bounds = array<i64: 8, 2, 32>}, {transform_indices = @transform_1, window_bounds = array<i64: 8, 1, 32>}, {transform_indices = @transform_2, window_bounds = array<i64: 8, 2, 32>}]} {
    %c0 = arith.constant 0 : index
    %c0_0 = arith.constant 0 : index
    %c0_1 = arith.constant 0 : index
    %0 = vector.load %arg1[%c0, %c0_0, %c0_1] : memref<8x2x32xf32, #tpu.memory_space<vmem>>, vector<8x2x32xf32>
    %c0_2 = arith.constant 0 : index
    %c0_3 = arith.constant 0 : index
    %c0_4 = arith.constant 0 : index
    %1 = vector.load %arg2[%c0_2, %c0_3, %c0_4] : memref<8x1x32xf32, #tpu.memory_space<vmem>>, vector<8x1x32xf32>
    %2 = vector.broadcast %1 : vector<8x1x32xf32> to vector<8x2x32xf32>
    %3 = arith.addf %0, %2 : vector<8x2x32xf32>
    %c0_5 = arith.constant 0 : index
    %c0_6 = arith.constant 0 : index
    %c0_7 = arith.constant 0 : index
    %4 = vector.load %arg3[%c0_5, %c0_6, %c0_7] : memref<8x2x32xf32, #tpu.memory_space<vmem>>, vector<8x2x32xf32>
    tpu.vector_store %arg3[%c0_5, %c0_6, %c0_7], %3 {strides = array<i32>} : memref<8x2x32xf32, #tpu.memory_space<vmem>>, vector<8x2x32xf32>,
    return
  }
  func.func @transform_0(%arg0: i32) -> (i32, i32, i32) {
    %c0_i32 = arith.constant 0 : i32
    %c0_i32_0 = arith.constant 0 : i32
    %c0_i32_1 = arith.constant 0 : i32
    return %arg0, %c0_i32, %c0_i32_0 : i32, i32, i32
  }
  func.func @transform_1(%arg0: i32) -> (i32, i32, i32) {
    %c0_i32 = arith.constant 0 : i32
    %c0_i32_0 = arith.constant 0 : i32
    %c0_i32_1 = arith.constant 0 : i32
    return %arg0, %c0_i32, %c0_i32_0 : i32, i32, i32
  }
  func.func @transform_2(%arg0: i32) -> (i32, i32, i32) {
    %c0_i32 = arith.constant 0 : i32
    %c0_i32_0 = arith.constant 0 : i32
    %c0_i32_1 = arith.constant 0 : i32
    return %arg0, %c0_i32, %c0_i32_0 : i32, i32, i32
  }
}

</mosaic_0001>

<bundles_post_ra>
// kernel: tpu_custom_call.1
= control target key start
LH: loop header
LB: loop body
LE: loop exit
PB: predicated region body
PF: predicated region fallthrough
CT: control target
= control target key end

     0   :  { %vm84_vm0 = vcmask 254976   ;;  %s230_s0 = inlined_call_operand.vmem [shape: f32[8,2,32], index: 0, kind: input, shape index: {}]   ;;  %s231_s1 = inlined_call_operand.vmem [shape: f32[64,1,32], index: 1, kind: input, shape index: {}]   ;;  %s232_s2 = inlined_call_operand.hbm [shape: f32[8,2,32], index: 2, kind: output, shape index: {}]  }
   0x1   :  { %v12_v0 = vld [vmem:[%s230_s0] sm:$0x3]  ;;  %v13_v3 = vld [vmem:[%s230_s0 + $0x2] sm:$0x3]  ;;  %v14_v5 = vld [vmem:[%s230_s0 + $0x4] sm:$0x3] }
   0x2   :  { %v109_v1 = vld [vmem:[%s231_s1] ss:$0 sm:$0xff]  ;;  %v110_v4 = vld [vmem:[%s231_s1 + $0x1] ss:$0 sm:$0xff]  ;;  %v111_v7 = vld [vmem:[%s231_s1 + $0x2] ss:$0 sm:$0xff] }
   0x3   :  { %v76_v2 = vadd.f32 %v109_v1, %v12_v0  ;;  %v77_v6 = vadd.f32 %v110_v4, %v13_v3  ;;  %v15_v8 = vld [vmem:[%s230_s0 + $0x6] sm:$0x3]  ;;  %v112_v9 = vld [vmem:[%s231_s1 + $0x3] ss:$0 sm:$0xff]  ;;  %v78_v10 = vadd.f32 %v111_v7, %v14_v5  ;;  %v16_v12 = vld [vmem:[%s230_s0 + $0x8] sm:$0x3] }
   0x4   :  { %v79_v11 = vadd.f32 %v112_v9, %v15_v8  ;;  %v113_v13 = vld [vmem:[%s231_s1 + $0x4] ss:$0 sm:$0xff]  ;;  %v17_v14 = vld [vmem:[%s230_s0 + $0xa] sm:$0x3]  ;;  %v114_v16 = vld [vmem:[%s231_s1 + $0x5] ss:$0 sm:$0xff] }
   0x5   :  { %85 = vst.msk [vmem:[#allocation2] sm:$0x3] %vm84_vm0, %v76_v2  ;;  %86 = vst.msk [vmem:[#allocation2 + $0x2] sm:$0x3] %vm84_vm0, %v77_v6  ;;  %v80_v15 = vadd.f32 %v113_v13, %v16_v12  ;;  %v18_v17 = vld [vmem:[%s230_s0 + $0xc] sm:$0x3]  ;;  %v81_v19 = vadd.f32 %v114_v16, %v17_v14 }
   0x6   :  { %v115_v18 = vld [vmem:[%s231_s1 + $0x6] ss:$0 sm:$0xff]  ;;  %87 = vst.msk [vmem:[#allocation2 + $0x4] sm:$0x3] %vm84_vm0, %v78_v10  ;;  %88 = vst.msk [vmem:[#allocation2 + $0x6] sm:$0x3] %vm84_vm0, %v79_v11 }
   0x7   :  { %v82_v20 = vadd.f32 %v115_v18, %v18_v17  ;;  %v19_v21 = vld [vmem:[%s230_s0 + $0xe] sm:$0x3]  ;;  %v116_v22 = vld [vmem:[%s231_s1 + $0x7] ss:$0 sm:$0xff] }
   0x8   :  { %7 = vsyncpa [#allocation3], 0  ;;  %89 = vst.msk [vmem:[#allocation2 + $0x8] sm:$0x3] %vm84_vm0, %v80_v15  ;;  %v83_v23 = vadd.f32 %v116_v22, %v19_v21  ;;  %s144_s13 = smov [#allocation2]  }
   0x9   :  { %s98_s14 = sshll.u32 %s144_s13, 4  ;;  %90 = vst.msk [vmem:[#allocation2 + $0xa] sm:$0x3] %vm84_vm0, %v81_v19  ;;  %91 = vst.msk [vmem:[#allocation2 + $0xc] sm:$0x3] %vm84_vm0, %v82_v20  ;;  %s99_s14 = int_to_ptr.vmem [resolvable:$true] %s98_s14 }
   0xa   :  { %92 = vst.msk [vmem:[#allocation2 + $0xe] sm:$0x3] %vm84_vm0, %v83_v23  ;;  %s120_s15 = scalar_lea.vmem %s99_s14, 256  ;;  %p125_p1 = scmp.lt.s32.totalorder %s99_s14, %s99_s14 }
   0xb   :  { %p121_p0 = scmp.ne.s32.totalorder %s99_s14, %s120_s15  ;;  %p126_p2 = scmp.lt.s32.totalorder %s120_s15, %s120_s15 }
   0xd   :  { %p127_p3 = por %p126_p2, %p125_p1 }
   0xf   :  { %p128_p4 = pnand %p127_p3, %p121_p0 }
  0x11   :  { %131 = shalt.err (!%p128_p4)
}
  0x12   :  { %s132_s16 = scalar_lea.hbm %s232_s2, 256 }
  0x13   :  { %p133_p5 = scmp.ne.s32.totalorder %s232_s2, %s132_s16  ;;  %p136_p6 = scmp.lt.u32.totalorder %s132_s16, %s232_s2 }
  0x15   :  { %p138_p7 = pnand %p136_p6, %p133_p5 }
  0x17   :  { %141 = shalt.err (!%p138_p7)
}
  0x18   :  { %s145_s21 = smov 32   ;;  %s146_s22 = smov 2  }
  0x19   :  { %104 = dma.vmem_to_hbm [thread:$0]  %s99_s14, 256, %s232_s2, [#allocation3], %s145_s21, %s145_s21, %s146_s22  }
  0x1a   :  { %142 = dma.done.wait [#allocation3], 256  }
  0x1b   :  { %143 = vsyncadd [#allocation3], 4294967040 }
  0x1c   :  { %108 = vsyncpa [#allocation3], 1 }

</bundles_post_ra>
